<compile_context>
chip_gen: v7x
topology: tpu7x:2x2x1
jax: 0.10.0
libtpu: 0.0.40
codegen_flags: <defaults>
</compile_context>

<pallas_src>
import functools

import jax
import jax.numpy as jnp
from jax.experimental import pallas as pl
from jax.experimental.pallas import tpu as pltpu


VMEM_LIMIT_BYTES = 48 * 1024 * 1024  # > v5e/v6e defaults, < v7x physical 64 MiB


# ------------------------------ Pallas kernels ------------------------------


def head_classify_kernel(high_ref, low_ref, w_cbr_ref, bn_b_ref,
                         w_high_s_ref, w_low_ref, bias_ref,
                         xk_ref, lowcls_ref):
    """LRASPPHead up to (and including) the two 1x1 classifiers.

    Channel-first, lane-dense per-(batch, spatial-tile) blocks:
      high_ref[0]: (Ch, THWh)   low_ref[0]:    (Cl, THWl)
      xk_ref[0]:   (K,  THWh)   lowcls_ref[0]: (K,  THWl)

    The scale branch (global pool + sigmoid) and the BatchNorm scale are
    pre-folded into w_high_s / w_cbr outside the kernel (both folds are exact
    because the classifiers are pure 1x1 convs, i.e. linear).
    """
    f32 = jnp.float32
    high = high_ref[0]                                                # (Ch, THWh) bf16

    # cbr branch: 1x1 conv (BN scale pre-folded) + bias + ReLU.
    cbr = jnp.dot(w_cbr_ref[...], high, preferred_element_type=f32)   # (Ci, THWh) f32
    cbr = jnp.maximum(cbr + bn_b_ref[...], 0.0).astype(high.dtype)

    # high_classifier with the per-batch sigmoid scale folded into its weight.
    # Classify BEFORE upsampling (1x1 conv commutes with per-channel bilinear
    # resize) -> only K channels go through the resizes downstream.
    xk_ref[0] = jnp.dot(w_high_s_ref[0], cbr,
                        preferred_element_type=f32).astype(xk_ref.dtype)

    # low_classifier + combined (b_low + b_high) bias, added exactly once here
    # (bilinear resize rows sum to 1, so the bias passes through unchanged).
    lowc = jnp.dot(w_low_ref[...], low_ref[0],
                   preferred_element_type=f32) + bias_ref[...]
    lowcls_ref[0] = lowc.astype(lowcls_ref.dtype)


def combine_wpass_kernel(xk_ref, lowcls_ref, rh1_ref, rw1t_ref, rw2t_ref, y2_ref):
    """Resize xk (high res -> low res), add low branch, then W-pass of the final
    resize.  All spatial maps here carry only K (num_classes) channels, so the
    whole thing is tiny; per-batch block."""
    f32 = jnp.float32
    bf = xk_ref.dtype
    _, K, Hh, Wh = xk_ref.shape
    Hl = rh1_ref.shape[0]
    Wl = rw2t_ref.shape[0]

    # resize1 W-pass as ONE flattened large-M matmul: (K*Hh, Wh) @ (Wh, Wl).
    y = jnp.dot(xk_ref[0].reshape(K * Hh, Wh), rw1t_ref[...],
                preferred_element_type=f32)
    y = y.reshape(K, Hh, Wl).astype(bf)

    # resize1 H-pass: batched contraction over K; the tiny 2-D factor is
    # broadcast in VMEM only (never replicated in HBM).
    rh1b = jnp.broadcast_to(rh1_ref[...][None], (K,) + rh1_ref.shape)  # (K, Hl, Hh)
    dims = (((2,), (1,)), ((0,), (0,)))
    xr = jax.lax.dot_general(rh1b, y, dims, preferred_element_type=f32)  # (K, Hl, Wl)

    comb = (xr + lowcls_ref[0].astype(f32)).astype(bf)                 # (K, Hl, Wl)

    # resize2 W-pass, flattened: (K*Hl, Wl) @ (Wl, W).
    y2 = jnp.dot(comb.reshape(K * Hl, Wl), rw2t_ref[...],
                 preferred_element_type=f32)
    y2_ref[0] = y2.reshape(K, Hl, -1).astype(y2_ref.dtype)


def hpass_kernel(y2_ref, rh2_ref, out_ref):
    """Final resize H-pass, tiled over output rows.  Per (batch, row-tile)
    block; the (K, Hl, W) input block is constant across row tiles (only
    re-DMA'd when the batch index changes)."""
    f32 = jnp.float32
    K = y2_ref.shape[1]
    rh2b = jnp.broadcast_to(rh2_ref[...][None], (K,) + rh2_ref.shape)  # (K, TH, Hl)
    dims = (((2,), (1,)), ((0,), (0,)))
    out = jax.lax.dot_general(rh2b, y2_ref[0], dims,
                              preferred_element_type=f32)              # (K, TH, W)
    out_ref[0] = out.astype(out_ref.dtype)


# ------------------------------ pallas_call wrappers -------------------------


def _const_spec_1(arr):
    zeros = (0,) * arr.ndim
    return pl.BlockSpec(arr.shape, lambda n: zeros)


def _const_spec_2(arr):
    zeros = (0,) * arr.ndim
    return pl.BlockSpec(arr.shape, lambda n, t: zeros)


def _num_spatial_tiles(hwh, hwl, max_high_tile=4096):
    """Tiles for the head kernel's flat-spatial axis: keep tiles lane-dense
    (multiples of 128) and no larger than max_high_tile lanes on the high map.
    Returns 1 at small shapes (whole map per block)."""
    t = 1
    while (hwh // t > max_high_tile
           and hwh % (2 * t) == 0 and hwl % (2 * t) == 0
           and (hwh // (2 * t)) % 128 == 0 and (hwl // (2 * t)) % 128 == 0):
        t *= 2
    return t


def _choose_tile_h(h, max_tile=32):
    """Output-row tile for the final H-pass: multiple of 8 (sublane), divides h."""
    for th in range(min(h, max_tile), 0, -1):
        if h % th == 0 and (th % 8 == 0 or th == h):
            return th
    return h


def head_classify(high_t, low_t, w_cbr, bn_b, w_high_s, w_low, bias):
    N, Ch, HWh = high_t.shape
    _, Cl, HWl = low_t.shape
    K, Ci = w_high_s.shape[1:]
    T = _num_spatial_tiles(HWh, HWl)
    thwh, thwl = HWh // T, HWl // T
    return pl.pallas_call(
        head_classify_kernel,
        out_shape=(jax.ShapeDtypeStruct((N, K, HWh), jnp.bfloat16),
                   jax.ShapeDtypeStruct((N, K, HWl), jnp.bfloat16)),
        grid=(N, T),
        in_specs=[
            pl.BlockSpec((1, Ch, thwh), lambda n, t: (n, 0, t)),
            pl.BlockSpec((1, Cl, thwl), lambda n, t: (n, 0, t)),
            _const_spec_2(w_cbr), _const_spec_2(bn_b),
            pl.BlockSpec((1, K, Ci), lambda n, t: (n, 0, 0)),
            _const_spec_2(w_low), _const_spec_2(bias),
        ],
        out_specs=(pl.BlockSpec((1, K, thwh), lambda n, t: (n, 0, t)),
                   pl.BlockSpec((1, K, thwl), lambda n, t: (n, 0, t))),
        compiler_params=pltpu.CompilerParams(
            dimension_semantics=("parallel", "parallel"),
            vmem_limit_bytes=VMEM_LIMIT_BYTES),
    )(high_t, low_t, w_cbr, bn_b, w_high_s, w_low, bias)


def combine_wpass(xk4, lowcls4, rh1, rw1t, rw2t):
    N, K, Hh, Wh = xk4.shape
    _, _, Hl, Wl = lowcls4.shape
    W = rw2t.shape[1]
    return pl.pallas_call(
        combine_wpass_kernel,
        out_shape=jax.ShapeDtypeStruct((N, K, Hl, W), jnp.bfloat16),
        grid=(N,),
        in_specs=[
            pl.BlockSpec((1, K, Hh, Wh), lambda n: (n, 0, 0, 0)),
            pl.BlockSpec((1, K, Hl, Wl), lambda n: (n, 0, 0, 0)),
            _const_spec_1(rh1), _const_spec_1(rw1t), _const_spec_1(rw2t),
        ],
        out_specs=pl.BlockSpec((1, K, Hl, W), lambda n: (n, 0, 0, 0)),
        compiler_params=pltpu.CompilerParams(
            dimension_semantics=("parallel",),
            vmem_limit_bytes=VMEM_LIMIT_BYTES),
    )(xk4, lowcls4, rh1, rw1t, rw2t)


def hpass_upsample(y2, rh2, out_h, out_w):
    N, K, Hl, W = y2.shape
    tile_h = _choose_tile_h(out_h)
    # TODO(synk): at real resolutions where W is not a multiple of 128, pad the
    #   lane axis (or emit a flat (K, TH*W) slab) to avoid masked partial stores.
    return pl.pallas_call(
        hpass_kernel,
        out_shape=jax.ShapeDtypeStruct((N, K, out_h, out_w), jnp.float32),
        grid=(N, out_h // tile_h),
        in_specs=[
            pl.BlockSpec((1, K, Hl, W), lambda n, ht: (n, 0, 0, 0)),
            pl.BlockSpec((tile_h, Hl), lambda n, ht: (ht, 0)),
        ],
        out_specs=pl.BlockSpec((1, K, tile_h, out_w), lambda n, ht: (n, 0, ht, 0)),
        compiler_params=pltpu.CompilerParams(
            dimension_semantics=("parallel", "parallel"),
            vmem_limit_bytes=VMEM_LIMIT_BYTES),
    )(y2, rh2)


# ------------------------------ glue (plain JAX) -----------------------------


def bilinear_axis_matrix(out_size, in_size):
    """Per-axis weights of F.interpolate(mode='bilinear', align_corners=False)."""
    scale = in_size / out_size
    i = jnp.arange(out_size, dtype=jnp.float32)
    src = jnp.maximum((i + 0.5) * scale - 0.5, 0.0)
    i0 = jnp.floor(src)
    w1 = src - i0
    i0 = jnp.clip(i0.astype(jnp.int32), 0, in_size - 1)
    i1 = jnp.clip(i0 + 1, 0, in_size - 1)
    rows = jnp.arange(out_size)
    r = jnp.zeros((out_size, in_size), jnp.float32)
    r = r.at[rows, i0].add(1.0 - w1)
    r = r.at[rows, i1].add(w1)
    return r


def _backbone_stage(x_nchw, stride, w):
    """Synthetic deterministic backbone stage: avg-pool(stride) + 1x1 conv + ReLU."""
    # TODO(synk): arbitrary `backbone` module replaced by this stand-in producing
    # the {'low', 'high'} feature dict.
    N, C, H, W = x_nchw.shape
    xp = x_nchw.reshape(N, C, H // stride, stride, W // stride, stride).mean(axis=(3, 5))
    return jnp.maximum(jnp.einsum("nchw,co->nohw", xp, w), 0.0)


def init_params(key, cin, cl, ch, k, ci):
    ks = jax.random.split(key, 12)
    n = lambda kk, shape, s=0.5: jax.random.normal(kk, shape, jnp.float32) * s
    gamma = 1.0 + 0.1 * jax.random.normal(ks[4], (ci,), jnp.float32)
    beta = 0.1 * jax.random.normal(ks[5], (ci,), jnp.float32)
    rmean = 0.1 * jax.random.normal(ks[6], (ci,), jnp.float32)
    rvar = 1.0 + 0.1 * jnp.abs(jax.random.normal(ks[7], (ci,), jnp.float32))
    inv = gamma / jnp.sqrt(rvar + 1e-5)               # fold BatchNorm2d (eval mode)
    return {
        # synthetic backbone projections (glue)
        "w_bb_low": n(ks[0], (cin, cl)),
        "w_bb_high": n(ks[1], (cin, ch)),
        # 1x1 Conv2d weights kept in PyTorch's (Cout, Cin) layout.
        "w_cbr": n(ks[2], (ci, ch)),
        "w_scale": n(ks[3], (ci, ch)),
        "bn_scale": inv[:, None],                     # (Ci, 1)
        "bn_bias": (beta - rmean * inv)[:, None],     # (Ci, 1)
        "w_low": n(ks[8], (k, cl)),
        "b_low": n(ks[9], (k, 1)),
        "w_high": n(ks[10], (k, ci)),
        "b_high": n(ks[11], (k, 1)),
    }


def lraspp_forward(x_nchw, params):
    """Eval-mode LRASPP.forward: backbone -> LRASPPHead -> bilinear upsample."""
    # TODO(synk): training branch (criterion / criterion_aux / KDLoss) is not
    # part of the inference hot path and is not implemented here.
    N, Cin, H, W = x_nchw.shape
    low = _backbone_stage(x_nchw, 4, params["w_bb_low"])      # (N, Cl, Hl, Wl)
    high = _backbone_stage(x_nchw, 8, params["w_bb_high"])    # (N, Ch, Hh, Wh)
    _, Cl, Hl, Wl = low.shape
    _, Ch, Hh, Wh = high.shape
    K = params["w_low"].shape[0]
    bf16 = jnp.bfloat16

    # Scale branch hoisted out of the kernel (f32, tiny): global pool + 1x1
    # conv + sigmoid, then folded into the (linear) high_classifier weight.
    pooled = high.mean(axis=(2, 3))                                   # (N, Ch) f32
    s = jax.nn.sigmoid(pooled @ params["w_scale"].T)                  # (N, Ci) f32
    w_high_s = (params["w_high"][None, :, :] * s[:, None, :]).astype(bf16)  # (N,K,Ci)

    # Fold the BatchNorm scale into the cbr conv weight (exact; bias in-kernel).
    w_cbr_f = (params["w_cbr"] * params["bn_scale"]).astype(bf16)     # (Ci, Ch)
    bias_comb = (params["b_low"] + params["b_high"]).astype(jnp.float32)

    high_t = high.reshape(N, Ch, Hh * Wh).astype(bf16)        # channel-first, lane-dense
    low_t = low.reshape(N, Cl, Hl * Wl).astype(bf16)

    # Kernel 1: fused head + both 1x1 classifiers (only K-channel maps leave).
    xk, lowcls = head_classify(high_t, low_t, w_cbr_f, params["bn_bias"],
                               w_high_s, params["w_low"].astype(bf16), bias_comb)

    # Small 2-D separable bilinear factors (no K-way replication in HBM).
    rh1 = bilinear_axis_matrix(Hl, Hh).astype(bf16)
    rw1t = bilinear_axis_matrix(Wl, Wh).T.astype(bf16)
    rh2 = bilinear_axis_matrix(H, Hl).astype(bf16)
    rw2t = bilinear_axis_matrix(W, Wl).T.astype(bf16)

    xk4 = xk.reshape(N, K, Hh, Wh)            # free (contiguous) XLA reshapes
    lowcls4 = lowcls.reshape(N, K, Hl, Wl)

    # Kernel 2: resize(high->low) + add + W-pass of the final resize.
    y2 = combine_wpass(xk4, lowcls4, rh1, rw1t, rw2t)          # (N, K, Hl, W) bf16
    # Kernel 3: final H-pass, tiled over output rows; output is NCHW f32.
    return hpass_upsample(y2, rh2, H, W)


def reference_forward(x_nchw, params):
    """Pure-JAX f32 reference following the original op order (for checking)."""
    N, Cin, H, W = x_nchw.shape
    low = _backbone_stage(x_nchw, 4, params["w_bb_low"])
    high = _backbone_stage(x_nchw, 8, params["w_bb_high"])
    _, Cl, Hl, Wl = low.shape
    _, Ch, Hh, Wh = high.shape
    K = params["w_low"].shape[0]

    hf = high.reshape(N, Ch, Hh * Wh)
    cbr = jnp.einsum("ic,ncp->nip", params["w_cbr"], hf)
    cbr = jnp.maximum(cbr * params["bn_scale"][None] + params["bn_bias"][None], 0.0)
    pooled = hf.mean(axis=2, keepdims=True)
    s = jax.nn.sigmoid(jnp.einsum("ic,ncp->nip", params["w_scale"], pooled))
    xh = cbr * s                                                    # (N, Ci, HWh)

    # dense-kron bilinear resize (reference only; the kernels use separable form)
    r1 = jnp.kron(bilinear_axis_matrix(Hl, Hh), bilinear_axis_matrix(Wl, Wh))
    xr = jnp.einsum("pq,niq->nip", r1, xh)                          # (N, Ci, HWl)
    lf = low.reshape(N, Cl, Hl * Wl)
    out = (jnp.einsum("kc,ncp->nkp", params["w_low"], lf) + params["b_low"][None]
           + jnp.einsum("ki,nip->nkp", params["w_high"], xr) + params["b_high"][None])
    r2 = jnp.kron(bilinear_axis_matrix(H, Hl), bilinear_axis_matrix(W, Wl))
    return jnp.einsum("pq,nkq->nkp", r2, out).reshape(N, K, H, W)


# ------------------------------ main -----------------------------------------


if __name__ == "__main__":
    N, Cin, H, W = 2, 3, 64, 64
    low_channels, high_channels, num_classes, inter_channels = 8, 16, 4, 32

    key = jax.random.PRNGKey(0)
    params = init_params(key, Cin, low_channels, high_channels, num_classes,
                         inter_channels)
    x = jax.random.normal(jax.random.fold_in(key, 99), (N, Cin, H, W), jnp.float32)

    fwd = jax.jit(functools.partial(lraspp_forward, params=params))
    out = jax.block_until_ready(fwd(x))
    assert out.shape == (N, num_classes, H, W), out.shape

    with jax.default_matmul_precision("highest"):
        ref = jax.block_until_ready(reference_forward(x, params))
    if not bool(jnp.allclose(out, ref, atol=3e-2, rtol=3e-2)):
        err = float(jnp.max(jnp.abs(out - ref)))
        raise AssertionError(f"Pallas LRASPP mismatch: max_abs_err={err:.4g}")

    print("KERNEL_OK")
</pallas_src>

<mosaic_0001>
module attributes {stable_mosaic.version = 11 : i64} {
  func.func private @main(%arg0: i32) attributes {dimension_semantics = [#tpu.dimension_semantics<core_parallel>], iteration_bounds = array<i64: 2>, tpu.core_type = #tpu.core_type<sc_scalar_subcore>, window_params = []} {
    return
  }
}

module attributes {stable_mosaic.version = 11 : i64} {
  func.func private @main(%arg0: i32) attributes {dimension_semantics = [#tpu.dimension_semantics<core_parallel>], iteration_bounds = array<i64: 2>, tpu.core_type = #tpu.core_type<sc_scalar_subcore>, window_params = []} {
    return
  }
}

module attributes {stable_mosaic.version = 11 : i64} {
  func.func @head_classify_kernel(%arg0: i32, %arg1: i32, %arg2: memref<1x16x64xbf16, #tpu.memory_space<vmem>>, %arg3: memref<1x8x256xbf16, #tpu.memory_space<vmem>>, %arg4: memref<32x16xbf16, #tpu.memory_space<vmem>>, %arg5: memref<32x1xf32, #tpu.memory_space<vmem>>, %arg6: memref<1x4x32xbf16, #tpu.memory_space<vmem>>, %arg7: memref<4x8xbf16, #tpu.memory_space<vmem>>, %arg8: memref<4x1xf32, #tpu.memory_space<vmem>>, %arg9: memref<1x4x64xbf16, #tpu.memory_space<vmem>>, %arg10: memref<1x4x256xbf16, #tpu.memory_space<vmem>>) attributes {dimension_semantics = [#tpu.dimension_semantics<parallel>, #tpu.dimension_semantics<parallel>], iteration_bounds = array<i64: 2, 1>, scalar_prefetch = 0 : i64, scratch_operands = 0 : i64, tpu.core_type = #tpu.core_type<tc>, window_params = [{transform_indices = @transform_0, window_bounds = array<i64: 1, 16, 64>}, {transform_indices = @transform_1, window_bounds = array<i64: 1, 8, 256>}, {pipeline_mode = #tpu.pipeline_mode<synchronous>, transform_indices = @transform_2, window_bounds = array<i64: 32, 16>}, {pipeline_mode = #tpu.pipeline_mode<synchronous>, transform_indices = @transform_3, window_bounds = array<i64: 32, 1>}, {transform_indices = @transform_4, window_bounds = array<i64: 1, 4, 32>}, {pipeline_mode = #tpu.pipeline_mode<synchronous>, transform_indices = @transform_5, window_bounds = array<i64: 4, 8>}, {pipeline_mode = #tpu.pipeline_mode<synchronous>, transform_indices = @transform_6, window_bounds = array<i64: 4, 1>}, {transform_indices = @transform_7, window_bounds = array<i64: 1, 4, 64>}, {transform_indices = @transform_8, window_bounds = array<i64: 1, 4, 256>}]} {
    %c0 = arith.constant 0 : index
    %c0_0 = arith.constant 0 : index
    %c0_1 = arith.constant 0 : index
    %0 = vector.load %arg2[%c0, %c0_0, %c0_1] : memref<1x16x64xbf16, #tpu.memory_space<vmem>>, vector<1x16x64xbf16>
    %1 = vector.shape_cast %0 : vector<1x16x64xbf16> to vector<16x64xbf16>
    %c0_2 = arith.constant 0 : index
    %c0_3 = arith.constant 0 : index
    %2 = vector.load %arg4[%c0_2, %c0_3] : memref<32x16xbf16, #tpu.memory_space<vmem>>, vector<32x16xbf16>
    %cst = arith.constant dense<0.000000e+00> : vector<32x64xf32>
    %3 = tpu.matmul %2, %1, %cst {dimension_numbers = #tpu.dot_dimension_numbers<[1], [0], [0], [1], [0, 0, 1, 1], [], []>} : vector<32x16xbf16>, vector<16x64xbf16>, vector<32x64xf32> -> vector<32x64xf32>
    %c0_4 = arith.constant 0 : index
    %c0_5 = arith.constant 0 : index
    %4 = vector.load %arg5[%c0_4, %c0_5] : memref<32x1xf32, #tpu.memory_space<vmem>>, vector<32x1xf32>
    %5 = vector.broadcast %4 : vector<32x1xf32> to vector<32x64xf32>
    %6 = arith.addf %3, %5 : vector<32x64xf32>
    %cst_6 = arith.constant 0.000000e+00 : f32
    %7 = vector.broadcast %cst_6 : f32 to vector<32x64xf32>
    %8 = arith.maximumf %6, %7 : vector<32x64xf32>
    %9 = arith.truncf %8 : vector<32x64xf32> to vector<32x64xbf16>
    %c0_7 = arith.constant 0 : index
    %c0_8 = arith.constant 0 : index
    %c0_9 = arith.constant 0 : index
    %10 = vector.load %arg6[%c0_7, %c0_8, %c0_9] : memref<1x4x32xbf16, #tpu.memory_space<vmem>>, vector<1x4x32xbf16>
    %11 = vector.shape_cast %10 : vector<1x4x32xbf16> to vector<4x32xbf16>
    %cst_10 = arith.constant dense<0.000000e+00> : vector<4x64xf32>
    %12 = tpu.matmul %11, %9, %cst_10 {dimension_numbers = #tpu.dot_dimension_numbers<[1], [0], [0], [1], [0, 0, 1, 1], [], []>} : vector<4x32xbf16>, vector<32x64xbf16>, vector<4x64xf32> -> vector<4x64xf32>
    %13 = arith.truncf %12 : vector<4x64xf32> to vector<4x64xbf16>
    %c0_11 = arith.constant 0 : index
    %c0_12 = arith.constant 0 : index
    %c0_13 = arith.constant 0 : index
    %14 = vector.load %arg9[%c0_11, %c0_12, %c0_13] : memref<1x4x64xbf16, #tpu.memory_space<vmem>>, vector<1x4x64xbf16>
    %15 = vector.shape_cast %14 : vector<1x4x64xbf16> to vector<4x64xbf16>
    %16 = vector.shape_cast %13 : vector<4x64xbf16> to vector<1x4x64xbf16>
    tpu.vector_store %arg9[%c0_11, %c0_12, %c0_13], %16 {strides = array<i32>} : memref<1x4x64xbf16, #tpu.memory_space<vmem>>, vector<1x4x64xbf16>,
    %c0_14 = arith.constant 0 : index
    %c0_15 = arith.constant 0 : index
    %17 = vector.load %arg7[%c0_14, %c0_15] : memref<4x8xbf16, #tpu.memory_space<vmem>>, vector<4x8xbf16>
    %c0_16 = arith.constant 0 : index
    %c0_17 = arith.constant 0 : index
    %c0_18 = arith.constant 0 : index
    %18 = vector.load %arg3[%c0_16, %c0_17, %c0_18] : memref<1x8x256xbf16, #tpu.memory_space<vmem>>, vector<1x8x256xbf16>
    %19 = vector.shape_cast %18 : vector<1x8x256xbf16> to vector<8x256xbf16>
    %cst_19 = arith.constant dense<0.000000e+00> : vector<4x256xf32>
    %20 = tpu.matmul %17, %19, %cst_19 {dimension_numbers = #tpu.dot_dimension_numbers<[1], [0], [0], [1], [0, 0, 1, 1], [], []>} : vector<4x8xbf16>, vector<8x256xbf16>, vector<4x256xf32> -> vector<4x256xf32>
    %c0_20 = arith.constant 0 : index
    %c0_21 = arith.constant 0 : index
    %21 = vector.load %arg8[%c0_20, %c0_21] : memref<4x1xf32, #tpu.memory_space<vmem>>, vector<4x1xf32>
    %22 = vector.broadcast %21 : vector<4x1xf32> to vector<4x256xf32>
    %23 = arith.addf %20, %22 : vector<4x256xf32>
    %24 = arith.truncf %23 : vector<4x256xf32> to vector<4x256xbf16>
    %c0_22 = arith.constant 0 : index
    %c0_23 = arith.constant 0 : index
    %c0_24 = arith.constant 0 : index
    %25 = vector.load %arg10[%c0_22, %c0_23, %c0_24] : memref<1x4x256xbf16, #tpu.memory_space<vmem>>, vector<1x4x256xbf16>
    %26 = vector.shape_cast %25 : vector<1x4x256xbf16> to vector<4x256xbf16>
    %27 = vector.shape_cast %24 : vector<4x256xbf16> to vector<1x4x256xbf16>
    tpu.vector_store %arg10[%c0_22, %c0_23, %c0_24], %27 {strides = array<i32>} : memref<1x4x256xbf16, #tpu.memory_space<vmem>>, vector<1x4x256xbf16>,
    return
  }
  func.func @transform_0(%arg0: i32, %arg1: i32) -> (i32, i32, i32) {
    %c0_i32 = arith.constant 0 : i32
    %c0_i32_0 = arith.constant 0 : i32
    return %arg0, %c0_i32, %arg1 : i32, i32, i32
  }
  func.func @transform_1(%arg0: i32, %arg1: i32) -> (i32, i32, i32) {
    %c0_i32 = arith.constant 0 : i32
    %c0_i32_0 = arith.constant 0 : i32
    return %arg0, %c0_i32, %arg1 : i32, i32, i32
  }
  func.func @transform_2(%arg0: i32, %arg1: i32) -> (i32, i32) {
    %c0_i32 = arith.constant 0 : i32
    %c0_i32_0 = arith.constant 0 : i32
    %c0_i32_1 = arith.constant 0 : i32
    return %c0_i32, %c0_i32_0 : i32, i32
  }
  func.func @transform_3(%arg0: i32, %arg1: i32) -> (i32, i32) {
    %c0_i32 = arith.constant 0 : i32
    %c0_i32_0 = arith.constant 0 : i32
    %c0_i32_1 = arith.constant 0 : i32
    return %c0_i32, %c0_i32_0 : i32, i32
  }
  func.func @transform_4(%arg0: i32, %arg1: i32) -> (i32, i32, i32) {
    %c0_i32 = arith.constant 0 : i32
    %c0_i32_0 = arith.constant 0 : i32
    %c0_i32_1 = arith.constant 0 : i32
    return %arg0, %c0_i32, %c0_i32_0 : i32, i32, i32
  }
  func.func @transform_5(%arg0: i32, %arg1: i32) -> (i32, i32) {
    %c0_i32 = arith.constant 0 : i32
    %c0_i32_0 = arith.constant 0 : i32
    %c0_i32_1 = arith.constant 0 : i32
    return %c0_i32, %c0_i32_0 : i32, i32
  }
  func.func @transform_6(%arg0: i32, %arg1: i32) -> (i32, i32) {
    %c0_i32 = arith.constant 0 : i32
    %c0_i32_0 = arith.constant 0 : i32
    %c0_i32_1 = arith.constant 0 : i32
    return %c0_i32, %c0_i32_0 : i32, i32
  }
  func.func @transform_7(%arg0: i32, %arg1: i32) -> (i32, i32, i32) {
    %c0_i32 = arith.constant 0 : i32
    %c0_i32_0 = arith.constant 0 : i32
    return %arg0, %c0_i32, %arg1 : i32, i32, i32
  }
  func.func @transform_8(%arg0: i32, %arg1: i32) -> (i32, i32, i32) {
    %c0_i32 = arith.constant 0 : i32
    %c0_i32_0 = arith.constant 0 : i32
    return %arg0, %c0_i32, %arg1 : i32, i32, i32
  }
}

module attributes {stable_mosaic.version = 11 : i64} {
  func.func @combine_wpass_kernel(%arg0: i32, %arg1: memref<1x4x8x8xbf16, #tpu.memory_space<vmem>>, %arg2: memref<1x4x16x16xbf16, #tpu.memory_space<vmem>>, %arg3: memref<16x8xbf16, #tpu.memory_space<vmem>>, %arg4: memref<8x16xbf16, #tpu.memory_space<vmem>>, %arg5: memref<16x64xbf16, #tpu.memory_space<vmem>>, %arg6: memref<1x4x16x64xbf16, #tpu.memory_space<vmem>>) attributes {dimension_semantics = [#tpu.dimension_semantics<parallel>], iteration_bounds = array<i64: 2>, scalar_prefetch = 0 : i64, scratch_operands = 0 : i64, tpu.core_type = #tpu.core_type<tc>, window_params = [{transform_indices = @transform_0, window_bounds = array<i64: 1, 4, 8, 8>}, {transform_indices = @transform_1, window_bounds = array<i64: 1, 4, 16, 16>}, {pipeline_mode = #tpu.pipeline_mode<synchronous>, transform_indices = @transform_2, window_bounds = array<i64: 16, 8>}, {pipeline_mode = #tpu.pipeline_mode<synchronous>, transform_indices = @transform_3, window_bounds = array<i64: 8, 16>}, {pipeline_mode = #tpu.pipeline_mode<synchronous>, transform_indices = @transform_4, window_bounds = array<i64: 16, 64>}, {transform_indices = @transform_5, window_bounds = array<i64: 1, 4, 16, 64>}]} {
    %c0 = arith.constant 0 : index
    %c0_0 = arith.constant 0 : index
    %c0_1 = arith.constant 0 : index
    %c0_2 = arith.constant 0 : index
    %0 = vector.load %arg1[%c0, %c0_0, %c0_1, %c0_2] : memref<1x4x8x8xbf16, #tpu.memory_space<vmem>>, vector<1x4x8x8xbf16>
    %1 = vector.shape_cast %0 : vector<1x4x8x8xbf16> to vector<4x8x8xbf16>
    %2 = vector.shape_cast %1 : vector<4x8x8xbf16> to vector<32x8xbf16>
    %c0_3 = arith.constant 0 : index
    %c0_4 = arith.constant 0 : index
    %3 = vector.load %arg4[%c0_3, %c0_4] : memref<8x16xbf16, #tpu.memory_space<vmem>>, vector<8x16xbf16>
    %cst = arith.constant dense<0.000000e+00> : vector<32x16xf32>
    %4 = tpu.matmul %2, %3, %cst {dimension_numbers = #tpu.dot_dimension_numbers<[1], [0], [0], [1], [0, 0, 1, 1], [], []>} : vector<32x8xbf16>, vector<8x16xbf16>, vector<32x16xf32> -> vector<32x16xf32>
    %5 = vector.shape_cast %4 : vector<32x16xf32> to vector<4x8x16xf32>
    %6 = arith.truncf %5 : vector<4x8x16xf32> to vector<4x8x16xbf16>
    %c0_5 = arith.constant 0 : index
    %c0_6 = arith.constant 0 : index
    %7 = vector.load %arg3[%c0_5, %c0_6] : memref<16x8xbf16, #tpu.memory_space<vmem>>, vector<16x8xbf16>
    %8 = vector.shape_cast %7 : vector<16x8xbf16> to vector<1x16x8xbf16>
    %9 = vector.shape_cast %8 : vector<1x16x8xbf16> to vector<1x16x8xbf16>
    %10 = vector.broadcast %9 : vector<1x16x8xbf16> to vector<4x16x8xbf16>
    %cst_7 = arith.constant dense<0.000000e+00> : vector<4x16x16xf32>
    %11 = tpu.matmul %10, %6, %cst_7 {dimension_numbers = #tpu.dot_dimension_numbers<[2], [1], [1], [2], [0, 0, 0, 1, 1, 2], [0], [0]>} : vector<4x16x8xbf16>, vector<4x8x16xbf16>, vector<4x16x16xf32> -> vector<4x16x16xf32>
    %c0_8 = arith.constant 0 : index
    %c0_9 = arith.constant 0 : index
    %c0_10 = arith.constant 0 : index
    %c0_11 = arith.constant 0 : index
    %12 = vector.load %arg2[%c0_8, %c0_9, %c0_10, %c0_11] : memref<1x4x16x16xbf16, #tpu.memory_space<vmem>>, vector<1x4x16x16xbf16>
    %13 = vector.shape_cast %12 : vector<1x4x16x16xbf16> to vector<4x16x16xbf16>
    %14 = arith.extf %13 : vector<4x16x16xbf16> to vector<4x16x16xf32>
    %15 = arith.addf %11, %14 : vector<4x16x16xf32>
    %16 = arith.truncf %15 : vector<4x16x16xf32> to vector<4x16x16xbf16>
    %17 = vector.shape_cast %16 : vector<4x16x16xbf16> to vector<64x16xbf16>
    %c0_12 = arith.constant 0 : index
    %c0_13 = arith.constant 0 : index
    %18 = vector.load %arg5[%c0_12, %c0_13] : memref<16x64xbf16, #tpu.memory_space<vmem>>, vector<16x64xbf16>
    %cst_14 = arith.constant dense<0.000000e+00> : vector<64x64xf32>
    %19 = tpu.matmul %17, %18, %cst_14 {dimension_numbers = #tpu.dot_dimension_numbers<[1], [0], [0], [1], [0, 0, 1, 1], [], []>} : vector<64x16xbf16>, vector<16x64xbf16>, vector<64x64xf32> -> vector<64x64xf32>
    %20 = vector.shape_cast %19 : vector<64x64xf32> to vector<4x16x64xf32>
    %21 = arith.truncf %20 : vector<4x16x64xf32> to vector<4x16x64xbf16>
    %c0_15 = arith.constant 0 : index
    %c0_16 = arith.constant 0 : index
    %c0_17 = arith.constant 0 : index
    %c0_18 = arith.constant 0 : index
    %22 = vector.load %arg6[%c0_15, %c0_16, %c0_17, %c0_18] : memref<1x4x16x64xbf16, #tpu.memory_space<vmem>>, vector<1x4x16x64xbf16>
    %23 = vector.shape_cast %22 : vector<1x4x16x64xbf16> to vector<4x16x64xbf16>
    %24 = vector.shape_cast %21 : vector<4x16x64xbf16> to vector<1x4x16x64xbf16>
    tpu.vector_store %arg6[%c0_15, %c0_16, %c0_17, %c0_18], %24 {strides = array<i32>} : memref<1x4x16x64xbf16, #tpu.memory_space<vmem>>, vector<1x4x16x64xbf16>,
    return
  }
  func.func @transform_0(%arg0: i32) -> (i32, i32, i32, i32) {
    %c0_i32 = arith.constant 0 : i32
    %c0_i32_0 = arith.constant 0 : i32
    %c0_i32_1 = arith.constant 0 : i32
    %c0_i32_2 = arith.constant 0 : i32
    return %arg0, %c0_i32, %c0_i32_0, %c0_i32_1 : i32, i32, i32, i32
  }
  func.func @transform_1(%arg0: i32) -> (i32, i32, i32, i32) {
    %c0_i32 = arith.constant 0 : i32
    %c0_i32_0 = arith.constant 0 : i32
    %c0_i32_1 = arith.constant 0 : i32
    %c0_i32_2 = arith.constant 0 : i32
    return %arg0, %c0_i32, %c0_i32_0, %c0_i32_1 : i32, i32, i32, i32
  }
  func.func @transform_2(%arg0: i32) -> (i32, i32) {
    %c0_i32 = arith.constant 0 : i32
    %c0_i32_0 = arith.constant 0 : i32
    %c0_i32_1 = arith.constant 0 : i32
    return %c0_i32, %c0_i32_0 : i32, i32
  }
  func.func @transform_3(%arg0: i32) -> (i32, i32) {
    %c0_i32 = arith.constant 0 : i32
    %c0_i32_0 = arith.constant 0 : i32
    %c0_i32_1 = arith.constant 0 : i32
    return %c0_i32, %c0_i32_0 : i32, i32
  }
  func.func @transform_4(%arg0: i32) -> (i32, i32) {
    %c0_i32 = arith.constant 0 : i32
    %c0_i32_0 = arith.constant 0 : i32
    %c0_i32_1 = arith.constant 0 : i32
    return %c0_i32, %c0_i32_0 : i32, i32
  }
  func.func @transform_5(%arg0: i32) -> (i32, i32, i32, i32) {
    %c0_i32 = arith.constant 0 : i32
    %c0_i32_0 = arith.constant 0 : i32
    %c0_i32_1 = arith.constant 0 : i32
    %c0_i32_2 = arith.constant 0 : i32
    return %arg0, %c0_i32, %c0_i32_0, %c0_i32_1 : i32, i32, i32, i32
  }
}

module attributes {stable_mosaic.version = 11 : i64} {
  func.func @hpass_kernel(%arg0: i32, %arg1: i32, %arg2: memref<1x4x16x64xbf16, #tpu.memory_space<vmem>>, %arg3: memref<32x16xbf16, #tpu.memory_space<vmem>>, %arg4: memref<1x4x32x64xf32, #tpu.memory_space<vmem>>) attributes {dimension_semantics = [#tpu.dimension_semantics<parallel>, #tpu.dimension_semantics<parallel>], iteration_bounds = array<i64: 2, 2>, scalar_prefetch = 0 : i64, scratch_operands = 0 : i64, tpu.core_type = #tpu.core_type<tc>, window_params = [{transform_indices = @transform_0, window_bounds = array<i64: 1, 4, 16, 64>}, {transform_indices = @transform_1, window_bounds = array<i64: 32, 16>}, {transform_indices = @transform_2, window_bounds = array<i64: 1, 4, 32, 64>}]} {
    %c0 = arith.constant 0 : index
    %c0_0 = arith.constant 0 : index
    %0 = vector.load %arg3[%c0, %c0_0] : memref<32x16xbf16, #tpu.memory_space<vmem>>, vector<32x16xbf16>
    %1 = vector.shape_cast %0 : vector<32x16xbf16> to vector<1x32x16xbf16>
    %2 = vector.shape_cast %1 : vector<1x32x16xbf16> to vector<1x32x16xbf16>
    %3 = vector.broadcast %2 : vector<1x32x16xbf16> to vector<4x32x16xbf16>
    %c0_1 = arith.constant 0 : index
    %c0_2 = arith.constant 0 : index
    %c0_3 = arith.constant 0 : index
    %c0_4 = arith.constant 0 : index
    %4 = vector.load %arg2[%c0_1, %c0_2, %c0_3, %c0_4] : memref<1x4x16x64xbf16, #tpu.memory_space<vmem>>, vector<1x4x16x64xbf16>
    %5 = vector.shape_cast %4 : vector<1x4x16x64xbf16> to vector<4x16x64xbf16>
    %cst = arith.constant dense<0.000000e+00> : vector<4x32x64xf32>
    %6 = tpu.matmul %3, %5, %cst {dimension_numbers = #tpu.dot_dimension_numbers<[2], [1], [1], [2], [0, 0, 0, 1, 1, 2], [0], [0]>} : vector<4x32x16xbf16>, vector<4x16x64xbf16>, vector<4x32x64xf32> -> vector<4x32x64xf32>
    %c0_5 = arith.constant 0 : index
    %c0_6 = arith.constant 0 : index
    %c0_7 = arith.constant 0 : index
    %c0_8 = arith.constant 0 : index
    %7 = vector.load %arg4[%c0_5, %c0_6, %c0_7, %c0_8] : memref<1x4x32x64xf32, #tpu.memory_space<vmem>>, vector<1x4x32x64xf32>
    %8 = vector.shape_cast %7 : vector<1x4x32x64xf32> to vector<4x32x64xf32>
    %9 = vector.shape_cast %6 : vector<4x32x64xf32> to vector<1x4x32x64xf32>
    tpu.vector_store %arg4[%c0_5, %c0_6, %c0_7, %c0_8], %9 {strides = array<i32>} : memref<1x4x32x64xf32, #tpu.memory_space<vmem>>, vector<1x4x32x64xf32>,
    return
  }
  func.func @transform_0(%arg0: i32, %arg1: i32) -> (i32, i32, i32, i32) {
    %c0_i32 = arith.constant 0 : i32
    %c0_i32_0 = arith.constant 0 : i32
    %c0_i32_1 = arith.constant 0 : i32
    %c0_i32_2 = arith.constant 0 : i32
    return %arg0, %c0_i32, %c0_i32_0, %c0_i32_1 : i32, i32, i32, i32
  }
  func.func @transform_1(%arg0: i32, %arg1: i32) -> (i32, i32) {
    %c0_i32 = arith.constant 0 : i32
    %c0_i32_0 = arith.constant 0 : i32
    return %arg1, %c0_i32 : i32, i32
  }
  func.func @transform_2(%arg0: i32, %arg1: i32) -> (i32, i32, i32, i32) {
    %c0_i32 = arith.constant 0 : i32
    %c0_i32_0 = arith.constant 0 : i32
    %c0_i32_1 = arith.constant 0 : i32
    return %arg0, %c0_i32, %arg1, %c0_i32_0 : i32, i32, i32, i32
  }
}

</mosaic_0001>

<bundles_post_ra>
// kernel: lraspp_forward.3
= control target key start
LH: loop header
LB: loop body
LE: loop exit
PB: predicated region body
PF: predicated region fallthrough
CT: control target
= control target key end

     0   :  { %s962_s27 = smov 0   ;;  %s964_s28 = smov 0   ;;  %s1035_s0 = inlined_call_operand.vmem [shape: bf16[2,16,64], index: 0, kind: input, shape index: {}]   ;;  %s1036_s1 = inlined_call_operand.vmem [shape: bf16[2,8,256], index: 1, kind: input, shape index: {}]   ;;  %s1037_s2 = inlined_call_operand.vmem [shape: bf16[32,16], index: 2, kind: input, shape index: {}]   ;;  %s1038_s3 = inlined_call_operand.vmem [shape: f32[32,1], index: 3, kind: input, shape index: {}]   ;;  %s1039_s4 = inlined_call_operand.vmem [shape: bf16[2,4,32], index: 4, kind: input, shape index: {}]   ;;  %s1040_s5 = inlined_call_operand.vmem [shape: bf16[4,8], index: 5, kind: input, shape index: {}]   ;;  %s1041_s6 = inlined_call_operand.vmem [shape: f32[4,1], index: 6, kind: input, shape index: {}]   ;;  %s1042_s7 = inlined_call_operand.vmem [shape: bf16[2,4,64], index: 7, kind: output, shape index: {0}]   ;;  %s1043_s8 = inlined_call_operand.vmem [shape: bf16[2,4,256], index: 8, kind: output, shape index: {1}]  }
   0x1   :  { %s966_s29 = smov 0  }
   0x2 LB: > { %s31_s30 = sadd.s32 1, %s908_s28  ;;  %p810_p0 = scmp.ge.s32.totalorder %s912_s29, 1  ;;  %s912_s29 = sphi %s966_s29, %s19_s29   ;;  %s908_s28 = sphi %s964_s28, %s1045_s28   ;;  %s904_s27 = sphi %s962_s27, %s1044_s27  }
   0x3   : > { %p33_p1 = scmp.ge.s32.totalorder %s31_s30, 2  ;;  %p312_p2 = scmp.lt.s32.totalorder %s912_s29, 3 }
   0x5   : > { %s1047_s30 = smov (%p33_p1, %s31_s30), 0  ;;  %p313_p3 = pnand %p810_p0, %p312_p2 }
   0x6   : > { %p373_p4 = scmp.lt.s32.totalorder (!%p313_p3), %s904_s27, 1  ;;  %v887_v0 = vld [vmem:[%s1037_s2] sm:$0xff] (!%p313_p3)   ;;  %vm459_vm0 = vcmask (!%p313_p3), 130048   ;;  %v914_v1 = vmov (!%p313_p3), 0   ;;  %v421_v3 = vld [vmem:[%s1038_s3 + $0x10] sm:$0xff] (!%p313_p3)  ;;  %v420_v4 = vld [vmem:[%s1038_s3 + $0x8] sm:$0xff] (!%p313_p3) }
   0x7   : > { %316 = sbr.rel (%p313_p3) target bundleno = 465 (0x1d1), region = 48  ;;  %844 = vmatprep.mubr.msk.bf16.mxu0 (!%p313_p3), %vm459_vm0, %v887_v0  ;;  %883 = vset.pattern.permute.xlu0 (!%p313_p3), %v914_v1  ;;  %v419_v2 = vld [vmem:[%s1038_s3] sm:$0xff] (!%p313_p3)  ;;  %v422_v5 = vld [vmem:[%s1038_s3 + $0x18] sm:$0xff] (!%p313_p3)  ;;  %vm586_vm1 = vcmask (!%p313_p3), 1043456   ;;  %v888_v9 = vld [vmem:[%s1037_s2 + $0x8] sm:$0xff] (!%p313_p3)   ;;  %vm582_vm2 = vcmask (!%p313_p3), 64512  }
   0x8   : > { %884 = vset.pattern.permute.xlu1 (!%p313_p3), %v914_v1  ;;  %425 = vperm.xlu0 (!%p313_p3), %883, %v419_v2   ;;  %v571_v11 = vld [vmem:[%s1041_s6] sm:$0xf] (!%p313_p3)  ;;  %v915_v14 = vmov (!%p313_p3), 0.0   ;;  %vm916_vm3 = vmmov (!%p313_p3), 0   ;;  %vm522_vm4 = vcmask (!%p313_p3), 261120   ;;  %vm567_vm5 = vcmask (!%p313_p3), 517120  }
   0x9   : > { %435 = vperm.xlu1 (!%p313_p3), %884, %v421_v3   ;;  %v569_v13 = vld [vmem:[%s1040_s5] sm:$0x3] (!%p313_p3)  ;;  %848 = vmatprep.subr.bf16.mxu1 (!%p313_p3), %v915_v14 }
   0xa   : > { %852 = vmatprep.mubr.msk.bf16.mxu1 (!%p313_p3), %vm916_vm3, %v915_v14 }
   0xc   : > { %430 = vperm.xlu0 (!%p313_p3), %883, %v420_v4  }
   0xd   : > { %440 = vperm.xlu1 (!%p313_p3), %884, %v422_v5  }
   0xe   : > { %s1049_s27 = smov (!%p373_p4, %s904_s27), 1 }
   0xf   : > { %s833_s15 = sshll.u32 %s1049_s27, 3  ;;  %s835_s14 = sshll.u32 %s1049_s27, 2 }
  0x10   : > { %s380_s18 = scalar_lea.vmem %s1035_s0, %s833_s15  ;;  %s389_s21 = scalar_lea.vmem %s1036_s1, %s833_s15  ;;  %574 = vperm.xlu0 %883, %v571_v11  }
  0x11   : > { %v885_v6 = vld [vmem:[%s380_s18] sm:$0xff]   ;;  %s815_s15 = sshll.u32 %s1049_s27, 1  ;;  %s410_s18 = scalar_lea.vmem %s1043_s8, %s835_s14 }
  0x12   : > { %v570_v7 = vld [vmem:[%s389_s21] sm:$0xff]  ;;  %842 = vmatprep.subr.bf16.mxu0 %v885_v6  ;;  %s394_s21 = scalar_lea.vmem %s1039_s4, %s815_s15  ;;  %s401_s23 = scalar_lea.vmem %s1042_s7, %s815_s15 }
  0x13   : > { %v826_v8 = vcombine.high %v570_v7, %v570_v7  ;;  %v825_v10 = vcombine.low %v570_v7, %v570_v7  ;;  %843 = vmatpush3.bf16.msra.mxu0 %v885_v6  ;;  %v521_v41 = vld [vmem:[%s394_s21] sm:$0x3] }
  0x15   : > { %827 = vmatprep.subr.msk.bf16.mxu0 %vm586_vm1, %v826_v8  ;;  %v588_v12 = vsel %vm586_vm1, %v825_v10, 0 }
  0x16   : > { %845 = vmatmul.mubr.msk.bf16.vlgmr.msra.gmra.mrb[0].mxu0 %vm459_vm0, %v888_v9 }
  0x17   : > { %594 = vmatpush1.bf16.msra.mxu0 %v588_v12  ;;  %625 = vmatprep.mubr.bf16.mxu0 %v914_v1 }
  0x1e   : > { %828 = vmatmul.mubr.msk.bf16.vlgmr.msra.gmra.mrb[4].mxu0 %vm582_vm2, %v569_v13 }
  0x87   : > { %v426_v16 = vpop.permute.xlu0 %425 }
  0x88   : > { %v436_v15 = vpop.permute.xlu1 %435 }
  0x8b   : > { %v431_v21 = vpop.permute.xlu0 %430 }
  0x8c   : > { %v441_v18 = vpop.permute.xlu1 %440 }
  0x8f   : > { %v575_v32 = vpop.permute.xlu0 %574 }
  0xe9   : > { %v846_v17 = vpop.f32.mrb[0].mxu0 }
  0xea   : > { %v509_v19 = vadd.f32 %v846_v17, %v436_v15  ;;  %v500_v20 = vpop.f32.mrb[1].mxu0 }
  0xeb   : > { %v501_v22 = vadd.f32 %v500_v20, %v426_v16  ;;  %v847_v23 = vpop.f32.mrb[2].mxu0 }
  0xec   : > { %v512_v24 = vadd.f32 %v847_v23, %v441_v18  ;;  %v503_v25 = vpop.f32.mrb[3].mxu0  ;;  %v517_v27 = vmax.f32 %v509_v19, 0.0 }
  0xed   : > { %v504_v26 = vadd.f32 %v503_v25, %v431_v21  ;;  %v515_v29 = vmax.f32 %v501_v22, 0.0 }
  0xee   : > { %v518_v28 = vmax.f32 %v512_v24, 0.0 }
  0xef   : > { %v516_v30 = vmax.f32 %v504_v26, 0.0 }
  0xf0   : > { %v520_v31 = vpack.c.bf16 %v518_v28, %v517_v27 }
  0xf1   : > { %v627_v33 = vpop.f32.mrb[4].mxu0  ;;  %v519_v34 = vpack.c.bf16 %v516_v30, %v515_v29 }
  0xf2   : > { %v628_v35 = vadd.f32 %v627_v33, %v575_v32  ;;  %v629_v36 = vpop.f32.mrb[5].mxu0 }
  0xf3   : > { %v630_v37 = vadd.f32 %v629_v36, %v575_v32  ;;  %849 = vmatpush3.bf16.msra.mxu1 %v519_v34  ;;  %v631_v38 = vpop.f32.mrb[6].mxu0 }
  0xf4   : > { %850 = vmatprep.subr.bf16.mxu1 %v915_v14  ;;  %v632_v39 = vpop.f32.mrb[7].mxu0 }
  0xf5   : > { %v829_v40 = vpack.c.bf16 %v630_v37, %v628_v35 }
  0xf7   : > { %830 = vst.sshfl [vmem:[%s410_s18] sm:$0x33 pattern:$0x76325410] %v829_v40  ;;  %851 = vmatpush3.bf16.msra.mxu1 %v520_v31 }
  0xfa   : > { %853 = vmatmul.mubr.msk.bf16.vlgmr.msra.gmra.mrb[0].mxu1 %vm522_vm4, %v521_v41 }
 0x1cd   : > { %v560_v42 = vpop.f32.mrb[0].mxu1 }
 0x1ce   : > { %v566_v43 = vpack.c.bf16 %v560_v42, %v560_v42  ;;  %v854_v44 = vpop.f32.mrb[1].mxu1 }
 0x1cf   : > { %v563_v45 = vpop.f32.mrb[2].mxu1 }
 0x1d0   : > { %568 = vst.msk [vmem:[%s401_s23] sm:$0x3] %vm567_vm5, %v566_v43  ;;  %v855_v46 = vpop.f32.mrb[3].mxu1 }
 0x1d1 PF: > { %s19_s29 = sadd.s32 1, %s912_s29   ;;  %s1044_s27 = smov %s908_s28 }
 0x1d2   : > { %p16_p5 = scmp.ge.s32.totalorder %s19_s29, 4   ;;  %s1045_s28 = smov %s1047_s30 }
 0x1d4   :  { %18 = sbr.rel (!%p16_p5) target bundleno = 2 (0x2), region = 96 }

// kernel: lraspp_forward.4
= control target key start
LH: loop header
LB: loop body
LE: loop exit
PB: predicated region body
PF: predicated region fallthrough
CT: control target
= control target key end

     0   :  { %s901_s18 = smov 0   ;;  %s966_s0 = inlined_call_operand.vmem [shape: bf16[2,4,8,8], index: 0, kind: input, shape index: {}]   ;;  %s967_s1 = inlined_call_operand.vmem [shape: bf16[2,4,16,16], index: 1, kind: input, shape index: {}]   ;;  %s968_s2 = inlined_call_operand.vmem [shape: bf16[16,8], index: 2, kind: input, shape index: {}]   ;;  %s969_s3 = inlined_call_operand.vmem [shape: bf16[8,16], index: 3, kind: input, shape index: {}]   ;;  %s970_s4 = inlined_call_operand.vmem [shape: bf16[16,64], index: 4, kind: input, shape index: {}]   ;;  %s971_s5 = inlined_call_operand.vmem [shape: bf16[2,4,16,64], index: 5, kind: output, shape index: {}]  }
   0x1 LB: > { %s725_s19 = sadd.s32 4294967295, %s867_s18   ;;  %p729_p0 = scmp.ge.s32.totalorder %s867_s18, 1  ;;  %s867_s18 = sphi %s901_s18, %s15_s18  }
   0x2   : > { %p197_p1 = scmp.lt.s32.totalorder %s867_s18, 3 }
   0x4   : > { %p198_p2 = pnand %p729_p0, %p197_p1 }
   0x5   : > { %v250_v0 = vld [vmem:[%s969_s3] sm:$0xf] (!%p198_p2)  ;;  %vm268_vm0 = vcmask (!%p198_p2), 1043456   ;;  %p230_p3 = scmp.lt.s32.totalorder (!%p198_p2), %s725_s19, 1  ;;  %vm261_vm1 = vcmask (!%p198_p2), 64512   ;;  %v869_v4 = vmov (!%p198_p2), 0.0  }
   0x6   : > { %201 = sbr.rel (%p198_p2) target bundleno = 683 (0x2ab), region = 40  ;;  %846 = vmatprep.subr.msk.bf16.mxu0 (!%p198_p2), %vm268_vm0, %v250_v0  ;;  %v270_v1 = vsel (!%p198_p2), %vm268_vm0, %v250_v0, 0  ;;  %812 = vmatprep.subr.bf16.mxu1 (!%p198_p2), %v869_v4  ;;  %vm870_vm2 = vmmov (!%p198_p2), 0   ;;  %v859_v13 = vld [vmem:[%s968_s2] sm:$0xff] (!%p198_p2)   ;;  %vm539_vm3 = vcmask (!%p198_p2), 130048   ;;  %vm649_vm4 = vcmask (!%p198_p2), 519168  }
   0x7   : > { %807 = vmatpush3.bf16.msra.mxu0 (!%p198_p2), %v270_v1  ;;  %814 = vmatprep.mubr.msk.bf16.mxu1 (!%p198_p2), %vm870_vm2, %v869_v4  ;;  %v860_v18 = vld [vmem:[%s970_s4] sm:$0xff] (!%p198_p2)  }
   0x8   : > { %818 = vmatprep.subr.bf16.mxu0 (!%p198_p2), %v869_v4 }
   0xd   : > { %s973_s19 = smov (!%p230_p3, %s725_s19), 1 }
   0xe   : > { %s760_s22 = sshll.u32 %s973_s19, 4  ;;  %s761_s30 = sshll.u32 %s973_s19, 5 }
   0xf   : > { %s234_s25 = scalar_lea.vmem %s966_s0, %s760_s22  ;;  %s239_s8 = scalar_lea.vmem %s967_s1, %s761_s30 }
  0x10   : > { %v857_v2 = vld [vmem:[%s234_s25] sm:$0xff]   ;;  %v858_v3 = vld [vmem:[%s234_s25 + $0x8] sm:$0xff]   ;;  %v788_v30 = vld [vmem:[%s239_s8 + $0x10] sm:$0xff]   ;;  %s244_s11 = scalar_lea.vmem %s971_s5, %s761_s30 }
  0x11   : > { %808 = vmatprep.mubr.msk.bf16.mxu0 %vm261_vm1, %v857_v2  ;;  %v772_v19 = vld [vmem:[%s239_s8] sm:$0xff]   ;;  %v787_v21 = vld [vmem:[%s239_s8 + $0x8] sm:$0xff]   ;;  %v781_v39 = vunpack.c.l.bf16 %v788_v30  ;;  %v789_v40 = vld [vmem:[%s239_s8 + $0x18] sm:$0xff]   ;;  %v782_v42 = vunpack.c.h.bf16 %v788_v30 }
  0x12   : > { %809 = vmatmul.mubr.msk.bf16.vlgmr.msra.gmra.mrb[0].mxu0 %vm261_vm1, %v858_v3  ;;  %v773_v20 = vunpack.c.l.bf16 %v772_v19  ;;  %v774_v22 = vunpack.c.h.bf16 %v772_v19  ;;  %v777_v26 = vunpack.c.l.bf16 %v787_v21  ;;  %v778_v27 = vunpack.c.h.bf16 %v787_v21 }
  0x13   : > { %820 = vmatprep.mubr.msk.bf16.mxu0 %vm870_vm2, %v869_v4  ;;  %v785_v46 = vunpack.c.l.bf16 %v789_v40  ;;  %v786_v47 = vunpack.c.h.bf16 %v789_v40 }
  0xe5   : > { %v810_v5 = vpop.f32.mrb[0].mxu0 }
  0xe6   : > { %v306_v6 = vpop.f32.mrb[1].mxu0  ;;  %v323_v10 = vpack.c.bf16 %v810_v5, %v810_v5 }
  0xe7   : > { %v321_v7 = vpack.c.bf16 %v306_v6, %v306_v6  ;;  %v811_v8 = vpop.f32.mrb[2].mxu0 }
  0xe8   : > { %v309_v9 = vpop.f32.mrb[3].mxu0  ;;  %v324_v14 = vpack.c.bf16 %v811_v8, %v811_v8  ;;  %v440_v16 = vsel %vm268_vm0, %v323_v10, 0 }
  0xe9   : > { %v322_v11 = vpack.c.bf16 %v309_v9, %v309_v9  ;;  %v352_v12 = vsel %vm268_vm0, %v321_v7, 0 }
  0xea   : > { %813 = vmatpush3.bf16.msra.mxu1 %v352_v12  ;;  %v484_v17 = vsel %vm268_vm0, %v324_v14, 0 }
  0xeb   : > { %v396_v15 = vsel %vm268_vm0, %v322_v11, 0  ;;  %824 = vmatprep.subr.bf16.mxu1 %v869_v4 }
  0xec   : > { %819 = vmatpush3.bf16.msra.mxu0 %v396_v15 }
  0xed   : > { %815 = vmatmul.mubr.msk.bf16.vlgmr.msra.gmra.mrb[0].mxu1 %vm261_vm1, %v859_v13  ;;  %830 = vmatprep.subr.bf16.mxu0 %v869_v4 }
  0xee   : > { %825 = vmatpush3.bf16.msra.mxu1 %v440_v16  ;;  %826 = vmatprep.mubr.msk.bf16.mxu1 %vm870_vm2, %v869_v4 }
  0xef   : > { %821 = vmatmul.mubr.msk.bf16.vlgmr.msra.gmra.mrb[4].mxu0 %vm261_vm1, %v859_v13  ;;  %836 = vmatprep.subr.bf16.mxu1 %v860_v18 }
  0xf0   : > { %831 = vmatpush3.bf16.msra.mxu0 %v484_v17  ;;  %832 = vmatprep.mubr.msk.bf16.mxu0 %vm870_vm2, %v869_v4 }
  0xf5   : > { %827 = vmatmul.mubr.msk.bf16.vlgmr.msra.gmra.mrb[4].mxu1 %vm261_vm1, %v859_v13 }
  0xf6   : > { %837 = vmatpush3.bf16.msra.mxu1 %v860_v18 }
  0xf7   : > { %833 = vmatmul.mubr.msk.bf16.vlgmr.msra.gmra.mrb[8].mxu0 %vm261_vm1, %v859_v13 }
 0x1c0   : > { %v388_v23 = vpop.f32.mrb[0].mxu1 }
 0x1c1   : > { %v389_v24 = vadd.f32 %v773_v20, %v388_v23  ;;  %v816_v25 = vpop.f32.mrb[1].mxu1 }
 0x1c2   : > { %v432_v28 = vpop.f32.mrb[4].mxu0  ;;  %v391_v29 = vpop.f32.mrb[2].mxu1 }
 0x1c3   : > { %v392_v31 = vadd.f32 %v774_v22, %v391_v29  ;;  %v822_v32 = vpop.f32.mrb[5].mxu0  ;;  %v817_v33 = vpop.f32.mrb[3].mxu1  ;;  %v433_v35 = vadd.f32 %v777_v26, %v432_v28 }
 0x1c4   : > { %v435_v34 = vpop.f32.mrb[6].mxu0 }
 0x1c5   : > { %v527_v36 = vpack.c.bf16 %v392_v31, %v389_v24  ;;  %v436_v37 = vadd.f32 %v778_v27, %v435_v34  ;;  %v823_v38 = vpop.f32.mrb[7].mxu0 }
 0x1c7   : > { %v528_v41 = vpack.c.bf16 %v436_v37, %v433_v35  ;;  %838 = vmatprep.mubr.msk.bf16.mxu1 %vm539_vm3, %v527_v36 }
 0x1c8   : > { %v476_v43 = vpop.f32.mrb[4].mxu1 }
 0x1c9   : > { %v477_v44 = vadd.f32 %v781_v39, %v476_v43  ;;  %839 = vmatmul.mubr.msk.bf16.vlgmr.msra.gmra.mrb[8].mxu1 %vm539_vm3, %v528_v41  ;;  %v828_v45 = vpop.f32.mrb[5].mxu1 }
 0x1ca   : > { %v520_v48 = vpop.f32.mrb[8].mxu0  ;;  %v479_v49 = vpop.f32.mrb[6].mxu1 }
 0x1cb   : > { %v480_v50 = vadd.f32 %v782_v42, %v479_v49  ;;  %v834_v51 = vpop.f32.mrb[9].mxu0  ;;  %v829_v52 = vpop.f32.mrb[7].mxu1  ;;  %v521_v54 = vadd.f32 %v785_v46, %v520_v48 }
 0x1cc   : > { %v523_v53 = vpop.f32.mrb[10].mxu0 }
 0x1cd   : > { %v529_v55 = vpack.c.bf16 %v480_v50, %v477_v44  ;;  %v524_v56 = vadd.f32 %v786_v47, %v523_v53  ;;  %v835_v57 = vpop.f32.mrb[11].mxu0 }
 0x1cf   : > { %v530_v58 = vpack.c.bf16 %v524_v56, %v521_v54  ;;  %842 = vmatprep.mubr.msk.bf16.mxu1 %vm539_vm3, %v529_v55 }
 0x1d1   : > { %843 = vmatmul.mubr.msk.bf16.gmra.mrb[12].mxu1 %vm539_vm3, %v530_v58 }
 0x29c   : > { %v840_v59 = vpop.f32.mrb[8].mxu1 }
 0x29d   : > { %v765_v60 = vpack.c.bf16 %v840_v59, %v840_v59  ;;  %v586_v61 = vpop.f32.mrb[9].mxu1 }
 0x29e   : > { %v763_v62 = vpack.c.bf16 %v586_v61, %v586_v61  ;;  %v841_v63 = vpop.f32.mrb[10].mxu1 }
 0x29f   : > { %652 = vst.msk [vmem:[%s244_s11 + $0x8] sm:$0xf] %vm649_vm4, %v765_v60  ;;  %v766_v0 = vpack.c.bf16 %v841_v63, %v841_v63  ;;  %v589_v1 = vpop.f32.mrb[11].mxu1 }
 0x2a0   : > { %650 = vst.msk [vmem:[%s244_s11] sm:$0xf] %vm649_vm4, %v763_v62  ;;  %v764_v2 = vpack.c.bf16 %v589_v1, %v589_v1 }
 0x2a1   : > { %653 = vst.msk [vmem:[%s244_s11 + $0xc] sm:$0xf] %vm649_vm4, %v766_v0 }
 0x2a2   : > { %651 = vst.msk [vmem:[%s244_s11 + $0x4] sm:$0xf] %vm649_vm4, %v764_v2 }
 0x2a4   : > { %v844_v3 = vpop.f32.mrb[12].mxu1 }
 0x2a5   : > { %v769_v4 = vpack.c.bf16 %v844_v3, %v844_v3  ;;  %v602_v5 = vpop.f32.mrb[13].mxu1 }
 0x2a6   : > { %v767_v6 = vpack.c.bf16 %v602_v5, %v602_v5  ;;  %v845_v7 = vpop.f32.mrb[14].mxu1 }
 0x2a7   : > { %656 = vst.msk [vmem:[%s244_s11 + $0x18] sm:$0xf] %vm649_vm4, %v769_v4  ;;  %v770_v8 = vpack.c.bf16 %v845_v7, %v845_v7  ;;  %v605_v9 = vpop.f32.mrb[15].mxu1 }
 0x2a8   : > { %654 = vst.msk [vmem:[%s244_s11 + $0x10] sm:$0xf] %vm649_vm4, %v767_v6  ;;  %v768_v10 = vpack.c.bf16 %v605_v9, %v605_v9 }
 0x2a9   : > { %657 = vst.msk [vmem:[%s244_s11 + $0x1c] sm:$0xf] %vm649_vm4, %v770_v8 }
 0x2aa   : > { %655 = vst.msk [vmem:[%s244_s11 + $0x14] sm:$0xf] %vm649_vm4, %v768_v10 }
 0x2ab PF: > { %s15_s18 = sadd.s32 1, %s867_s18  }
 0x2ac   : > { %p12_p4 = scmp.ge.s32.totalorder %s15_s18, 4  }
 0x2ae   :  { %14 = sbr.rel (!%p12_p4) target bundleno = 1 (0x1), region = 73 }

// kernel: lraspp_forward.5
= control target key start
LH: loop header
LB: loop body
LE: loop exit
PB: predicated region body
PF: predicated region fallthrough
CT: control target
= control target key end

     0   :  { %7 = vsyncpa [#allocation3], 0  ;;  %s1005_s0 = inlined_call_operand.vmem [shape: bf16[2,4,16,64], index: 0, kind: input, shape index: {}]   ;;  %s1006_s1 = inlined_call_operand.vmem [shape: bf16[64,16], index: 1, kind: input, shape index: {}]   ;;  %s1007_s2 = inlined_call_operand.hbm [shape: f32[2,4,64,64], index: 2, kind: output, shape index: {}]  }
   0x1   :  { %9 = vsyncpa [#allocation3 + $0x1], 0  ;;  %s826_s9 = smov 0   ;;  %s828_s10 = smov 0  }
   0x2   :  { %s830_s11 = smov 0   ;;  %s832_s12 = smov 0  }
   0x3   :  { %s834_s13 = smov 0   ;;  %s836_s14 = smov 0  }
   0x4   :  { %s838_s15 = smov 0   ;;  %s840_s16 = smov 0  }
   0x5 LB: > { %s579_s17 = sadd.s32 4294967295, %s802_s16   ;;  %s580_s18 = sadd.s32 4294967294, %s802_s16   ;;  %s802_s16 = sphi %s840_s16, %s15_s16   ;;  %s798_s15 = sphi %s838_s15, %s1016_s15   ;;  %s794_s14 = sphi %s836_s14, %s1015_s14   ;;  %s790_s13 = sphi %s834_s13, %s1014_s13   ;;  %s786_s12 = sphi %s832_s12, %s1013_s12   ;;  %s782_s11 = sphi %s830_s11, %s1012_s11   ;;  %s778_s10 = sphi %s828_s10, %s1011_s10   ;;  %s774_s9 = sphi %s826_s9, %s1010_s9  }
   0x6   : > { %s24_s19 = sadd.s32 1, %s794_s14  ;;  %s27_s20 = sadd.s32 1, %s798_s15 }
   0x7   : > { %p25_p0 = scmp.ge.s32.totalorder %s24_s19, 2  ;;  %p98_p1 = scmp.ne.s32.totalorder %s782_s11, %s778_s10 }
   0x8   : > { %p99_p2 = scmp.eq.s32.totalorder %s579_s17, 3  ;;  %p104_p5 = scmp.ne.s32.totalorder %s778_s10, %s774_s9 }
   0x9   : > { %s1018_s19 = smov (%p25_p0, %s24_s19), 0  ;;  %s1020_s20 = smov (!%p25_p0, %s27_s20), %s798_s15 }
   0xa   : > { %s84_s21 = ssub.s32 %s794_s14, %s1018_s19  ;;  %p877_p3 = por %p99_p2, %p98_p1 }
   0xb   : > { %p29_p4 = scmp.ge.s32.totalorder %s1020_s20, 2  ;;  %p105_p6 = scmp.eq.s32.totalorder %s580_s18, 3 }
   0xc   : > { %p583_p7 = scmp.ge.s32.totalorder %s802_s16, 1  ;;  %p140_p9 = scmp.lt.s32.totalorder %s802_s16, 5 }
   0xd   : > { %s1022_s20 = smov (%p29_p4, %s1020_s20), 0  ;;  %p886_p8 = por %p105_p6, %p104_p5 }
   0xe   : > { %s83_s24 = ssub.s32 %s798_s15, %s1022_s20  ;;  %s88_s25 = sadd.s32 1, %s782_s11 }
   0xf   : > { %s85_s26 = sor.u32 %s84_s21, %s83_s24  ;;  %p141_p10 = pnand %p583_p7, %p140_p9 }
  0x10   : > { %p86_p11 = scmp.eq.s32.totalorder %s85_s26, 0  ;;  %p167_p12 = scmp.lt.s32.totalorder (!%p141_p10), %s790_s13, 1  ;;  %vm208_vm0 = vcmask (!%p141_p10), 130048   ;;  %vm429_vm1 = vcmask (!%p141_p10), 523264  }
  0x11   : > { %144 = sbr.rel (%p141_p10) target bundleno = 267 (0x10b), region = 28  ;;  %s899_s28 = sshll.u32 (!%p141_p10), %s786_s12, 2 }
  0x12   : > { %s895_s27 = scalar_select %p86_p11, %s782_s11, %s88_s25  }
  0x13   : > { %p173_p13 = scmp.lt.s32.totalorder (!%p141_p10), %s899_s28, 7  ;;  %s164_s12 = sand.u32 (!%p141_p10), 1, %s778_s10  }
  0x14   : > { %s584_s21 = sshll.u32 (!%p141_p10), %s164_s12, 7  ;;  %s447_s25 = scalar_lea.sflag (!%p141_p10), [#allocation3], %s164_s12 }
  0x15   : > { %s921_s24 = scalar_lea.vmem (!%p141_p10), [#allocation2], %s584_s21 }
  0x18   : > { %s168_s29 = scalar_select %p167_p12, %s790_s13, 1 }
  0x19   : > { %s174_s30 = scalar_select %p173_p13, %s899_s28, 7 }
  0x1a   : > { %s609_s3 = sshll.u32 %s168_s29, 5 }
  0x1b   : > { %s171_s6 = scalar_lea.vmem %s1005_s0, %s609_s3  ;;  %s588_s7 = sshll.u32 %s174_s30, 2 }
  0x1c   : > { %v730_v0 = vld [vmem:[%s171_s6] sm:$0xff]   ;;  %s176_s18 = scalar_lea.vmem %s1006_s1, %s588_s7  ;;  %v731_v1 = vld [vmem:[%s171_s6 + $0x8] sm:$0xff]   ;;  %v734_v4 = vld [vmem:[%s171_s6 + $0x10] sm:$0xff]  }
  0x1d   : > { %622 = vmatprep.subr.bf16.mxu0 %v730_v0  ;;  %v732_v2 = vld [vmem:[%s176_s18] sm:$0xff]   ;;  %628 = vmatprep.subr.bf16.mxu1 %v731_v1  ;;  %v733_v3 = vld [vmem:[%s176_s18 + $0x8] sm:$0xff]   ;;  %v735_v5 = vld [vmem:[%s171_s6 + $0x18] sm:$0xff]  }
  0x1e   : > { %623 = vmatpush3.bf16.msra.mxu0 %v730_v0  ;;  %629 = vmatpush3.bf16.msra.mxu1 %v731_v1 }
  0x1f   : > { %624 = vmatprep.mubr.msk.bf16.mxu0 %vm208_vm0, %v732_v2  ;;  %630 = vmatprep.mubr.msk.bf16.mxu1 %vm208_vm0, %v732_v2 }
  0x20   : > { %634 = vmatprep.subr.bf16.mxu0 %v734_v4  ;;  %640 = vmatprep.subr.bf16.mxu1 %v735_v5 }
  0x21   : > { %625 = vmatmul.mubr.msk.bf16.vlgmr.msra.gmra.mrb[0].mxu0 %vm208_vm0, %v733_v3  ;;  %631 = vmatmul.mubr.msk.bf16.vlgmr.msra.gmra.mrb[0].mxu1 %vm208_vm0, %v733_v3 }
  0x22   : > { %635 = vmatpush3.bf16.msra.mxu0 %v734_v4  ;;  %641 = vmatpush3.bf16.msra.mxu1 %v735_v5 }
  0x23   : > { %636 = vmatprep.mubr.msk.bf16.mxu0 %vm208_vm0, %v732_v2  ;;  %642 = vmatprep.mubr.msk.bf16.mxu1 %vm208_vm0, %v732_v2 }
  0x29   : > { %637 = vmatmul.mubr.msk.bf16.vlgmr.msra.gmra.mrb[4].mxu0 %vm208_vm0, %v733_v3  ;;  %643 = vmatmul.mubr.msk.bf16.vlgmr.msra.gmra.mrb[4].mxu1 %vm208_vm0, %v733_v3 }
  0xf4   : > { %v626_v6 = vpop.f32.mrb[0].mxu0  ;;  %v632_v7 = vpop.f32.mrb[0].mxu1 }
  0xf5   : > { %432 = vst.msk [vmem:[%s921_s24 + $0x10] sm:$0xff] %vm429_vm1, %v626_v6  ;;  %v249_v8 = vpop.f32.mrb[1].mxu0  ;;  %436 = vst.msk [vmem:[%s921_s24 + $0x30] sm:$0xff] %vm429_vm1, %v632_v7  ;;  %v304_v9 = vpop.f32.mrb[1].mxu1 }
  0xf6   : > { %430 = vst.msk [vmem:[%s921_s24] sm:$0xff] %vm429_vm1, %v249_v8  ;;  %v627_v10 = vpop.f32.mrb[2].mxu0  ;;  %434 = vst.msk [vmem:[%s921_s24 + $0x20] sm:$0xff] %vm429_vm1, %v304_v9  ;;  %v633_v11 = vpop.f32.mrb[2].mxu1 }
  0xf7   : > { %433 = vst.msk [vmem:[%s921_s24 + $0x18] sm:$0xff] %vm429_vm1, %v627_v10  ;;  %v252_v12 = vpop.f32.mrb[3].mxu0  ;;  %437 = vst.msk [vmem:[%s921_s24 + $0x38] sm:$0xff] %vm429_vm1, %v633_v11  ;;  %v307_v13 = vpop.f32.mrb[3].mxu1 }
  0xf8   : > { %431 = vst.msk [vmem:[%s921_s24 + $0x8] sm:$0xff] %vm429_vm1, %v252_v12  ;;  %435 = vst.msk [vmem:[%s921_s24 + $0x28] sm:$0xff] %vm429_vm1, %v307_v13 }
  0xfc   : > { %v638_v14 = vpop.f32.mrb[4].mxu0  ;;  %v644_v15 = vpop.f32.mrb[4].mxu1 }
  0xfd   : > { %440 = vst.msk [vmem:[%s921_s24 + $0x50] sm:$0xff] %vm429_vm1, %v638_v14  ;;  %v359_v16 = vpop.f32.mrb[5].mxu0  ;;  %444 = vst.msk [vmem:[%s921_s24 + $0x70] sm:$0xff] %vm429_vm1, %v644_v15  ;;  %v414_v17 = vpop.f32.mrb[5].mxu1 }
  0xfe   : > { %438 = vst.msk [vmem:[%s921_s24 + $0x40] sm:$0xff] %vm429_vm1, %v359_v16  ;;  %v639_v18 = vpop.f32.mrb[6].mxu0  ;;  %442 = vst.msk [vmem:[%s921_s24 + $0x60] sm:$0xff] %vm429_vm1, %v414_v17  ;;  %v645_v19 = vpop.f32.mrb[6].mxu1 }
  0xff   : > { %441 = vst.msk [vmem:[%s921_s24 + $0x58] sm:$0xff] %vm429_vm1, %v639_v18  ;;  %v362_v20 = vpop.f32.mrb[7].mxu0  ;;  %445 = vst.msk [vmem:[%s921_s24 + $0x78] sm:$0xff] %vm429_vm1, %v645_v19  ;;  %v417_v21 = vpop.f32.mrb[7].mxu1 }
 0x100   : > { %439 = vst.msk [vmem:[%s921_s24 + $0x48] sm:$0xff] %vm429_vm1, %v362_v20  ;;  %443 = vst.msk [vmem:[%s921_s24 + $0x68] sm:$0xff] %vm429_vm1, %v417_v21 }
 0x101   : > { %s605_s26 = sshll.u32 %s790_s13, 5  ;;  %s478_s29 = sshll.u32 %s921_s24, 4  ;;  %s479_s29 = int_to_ptr.vmem [resolvable:$true] %s478_s29 }
 0x102   : > { %s459_s30 = sadd.s32 %s605_s26, %s899_s28  ;;  %s804_s7 = smov 512  }
 0x103   : > { %s606_s3 = sshll.u32 %s459_s30, 7  ;;  %646 = sst [smem:[#allocation5]] (%p877_p3), %s804_s7 }
 0x104   : > { %s461_s6 = scalar_lea.hbm %s1007_s2, %s606_s3  ;;  %s805_s8 = smov 1024  }
 0x105   : > { %647 = sst [smem:[#allocation5 + $0x1]] (%p877_p3), %s805_s8  ;;  %s806_s17 = smov 4  }
 0x106   : > { %648 = sst [smem:[#allocation5 + $0x2]] (%p877_p3), %s806_s17  ;;  %s807_s13 = smov 128  }
 0x107   : > { %649 = sst [smem:[#allocation5 + $0x3]] (%p877_p3), %s807_s13  ;;  %s808_s28 = smov 8  }
 0x108   : > { %650 = sst [smem:[#allocation5 + $0x4]] (%p877_p3), %s807_s13  ;;  %s809_s18 = smov [#allocation4]  }
 0x109   : > { %651 = sst [smem:[#allocation5 + $0x5]] (%p877_p3), %s808_s28  ;;  %s810_s12 = smov 0  }
 0x10a   : > { %652 = dma.general (%p877_p3), %s479_s29, 2048, %s461_s6, %s447_s25, %s809_s18, [#allocation5], %s810_s12, 0  }
 0x10b PF: > { %p658_p0 = scmp.ge.s32.totalorder %s802_s16, 2  ;;  %s506_s21 = sand.u32 1, %s774_s9  }
 0x10c   : > { %s507_s24 = scalar_lea.sflag [#allocation3], %s506_s21 }
 0x10d   : > { %p655_p1 = pnand %p658_p0, %p886_p8 }
 0x10f   : > { %769 = dma.done.wait (!%p655_p1), %s507_s24, 2048  }
 0x110   : > { %771 = vsyncadd (!%p655_p1), %s507_s24, 4294965248  ;;  %s15_s16 = sadd.s32 1, %s802_s16   ;;  %s1010_s9 = smov %s778_s10 }
 0x111   : > { %p12_p2 = scmp.ge.s32.totalorder %s15_s16, 6   ;;  %s1011_s10 = smov %s782_s11 }
 0x112   : > { %s1012_s11 = smov %s895_s27  ;;  %s1013_s12 = smov %s794_s14 }
 0x113   : > { %s1014_s13 = smov %s798_s15  ;;  %s1015_s14 = smov %s1018_s19 }
 0x114   : > { %s1016_s15 = smov %s1022_s20  ;;  %14 = sbr.rel (!%p12_p2) target bundleno = 5 (0x5), region = 71 }
 0x11b   :  { %512 = vsyncpa [#allocation3], 1 }
 0x11c   :  { %514 = vsyncpa [#allocation3 + $0x1], 1 }

</bundles_post_ra>
